<compile_context>
chip_gen: v6e
topology: v6e:2x2x1
jax: 0.10.0
libtpu: 0.0.40
codegen_flags: <defaults>
</compile_context>

<pallas_src>
import functools

import jax
import jax.numpy as jnp
from jax.experimental import pallas as pl
from jax.experimental.pallas import tpu as pltpu


def _mlp_kernel(x_ref, w1_ref, b1_ref, w2_ref, b2_ref, w3_ref, b3_ref, o_ref):
    # Three MXU matmuls (bf16 operands, f32 accumulation) + f32 bias/ReLU on the VPU,
    # all VMEM-resident for one batch tile.  The f32->bf16 cast of x happens here,
    # on-chip, so x is read from HBM exactly once.
    x = x_ref[...].astype(w1_ref.dtype)
    h = jnp.dot(x, w1_ref[...], preferred_element_type=jnp.float32) + b1_ref[...]
    h = jnp.maximum(h, 0.0)
    h = jnp.dot(h.astype(w2_ref.dtype), w2_ref[...],
                preferred_element_type=jnp.float32) + b2_ref[...]
    h = jnp.maximum(h, 0.0)
    out = jnp.dot(h.astype(w3_ref.dtype), w3_ref[...],
                  preferred_element_type=jnp.float32) + b3_ref[...]
    o_ref[...] = out.astype(o_ref.dtype)


def _round_up(x, m):
    return ((x + m - 1) // m) * m


@functools.partial(jax.jit, static_argnames=("block_b", "matmul_dtype"))
def _domain_classifier_pallas(x, w1, b1, w2, b2, w3, b3, *, block_b, matmul_dtype):
    B, embed_dim = x.shape
    h1 = w1.shape[1]
    h2 = w2.shape[1]
    n_out = w3.shape[1]  # == 2
    out_dtype = x.dtype

    # Only the tiny weights/biases are converted at the boundary; x stays f32 in HBM.
    w1m = w1.astype(matmul_dtype)
    w2m = w2.astype(matmul_dtype)
    w3m = w3.astype(matmul_dtype)
    b1f = b1.reshape(1, h1).astype(jnp.float32)
    b2f = b2.reshape(1, h2).astype(jnp.float32)
    b3f = b3.reshape(1, n_out).astype(jnp.float32)

    grid = (pl.cdiv(B, block_b),)  # ragged last block handled by Pallas (masked writes)

    # Weights/biases are ~20 KiB total: keep them fully VMEM-resident via constant
    # index_maps.  Only the x tile and the h1/h2 intermediates drive the VMEM budget.
    full = lambda shape: pl.BlockSpec(shape, lambda i: (0,) * len(shape))

    wsize = jnp.dtype(matmul_dtype).itemsize
    flops = 2 * B * (embed_dim * h1 + h1 * h2 + h2 * n_out)
    bytes_accessed = (
        B * embed_dim * jnp.dtype(x.dtype).itemsize                 # x stream (1 pass)
        + B * n_out * jnp.dtype(out_dtype).itemsize                 # output
        + (embed_dim * h1 + h1 * h2 + h2 * n_out) * wsize           # weights
        + (h1 + h2 + n_out) * 4                                     # biases (f32)
    )

    return pl.pallas_call(
        _mlp_kernel,
        out_shape=jax.ShapeDtypeStruct((B, n_out), out_dtype),
        grid_spec=pltpu.PrefetchScalarGridSpec(
            num_scalar_prefetch=0,
            grid=grid,
            in_specs=[
                pl.BlockSpec((block_b, embed_dim), lambda i: (i, 0)),
                full((embed_dim, h1)),
                full((1, h1)),
                full((h1, h2)),
                full((1, h2)),
                full((h2, n_out)),
                full((1, n_out)),
            ],
            out_specs=pl.BlockSpec((block_b, n_out), lambda i: (i, 0)),
        ),
        compiler_params=pltpu.CompilerParams(
            dimension_semantics=("parallel",),
            vmem_limit_bytes=32 * 1024 * 1024,
        ),
        cost_estimate=pl.CostEstimate(
            flops=flops, transcendentals=0, bytes_accessed=bytes_accessed),
    )(x, w1m, b1f, w2m, b2f, w3m, b3f)


def _pick_block_b(B):
    # ~2 grid steps (v7x megacore gets both TCs busy), 512-row granularity, capped so
    # per-step VMEM (~0.9 KiB/row incl. double-buffering) stays < 8 MiB on every gen.
    return max(512, min(8192, _round_up(pl.cdiv(B, 2), 512)))


def domain_classifier_forward(x, w1, b1, w2, b2, w3, b3, *,
                              block_b=None, matmul_dtype=jnp.bfloat16):
    """Fused DomainClassifier forward.

    block_b: batch tile (multiple of 16; 4096-16384 recommended for large B).
             None -> auto (~B/2 rounded to 512, capped at 8192).
    matmul_dtype: MXU operand dtype (bf16 default; pass jnp.float32 for bit-closer
             parity with the f32 PyTorch reference -- the kernel is bandwidth-bound,
             not FLOP-bound, at these feature dims).
    """
    if block_b is None:
        block_b = _pick_block_b(x.shape[0])
    assert block_b % 16 == 0, "block_b must be a multiple of 16 (bf16 sublane packing)"
    return _domain_classifier_pallas(x, w1, b1, w2, b2, w3, b3,
                                     block_b=block_b, matmul_dtype=matmul_dtype)


def init_params(key, embed_dim, h1, h2):
    """Deterministic synthetic init (PyTorch-like uniform fan-in), stored as (in, out)."""
    ks = jax.random.split(key, 6)

    def lin(kw, kb, fan_in, fan_out):
        bound = 1.0 / jnp.sqrt(fan_in)
        w = jax.random.uniform(kw, (fan_in, fan_out), jnp.float32, -bound, bound)
        b = jax.random.uniform(kb, (1, fan_out), jnp.float32, -bound, bound)
        return w, b

    w1, b1 = lin(ks[0], ks[1], embed_dim, h1)
    w2, b2 = lin(ks[2], ks[3], h1, h2)
    w3, b3 = lin(ks[4], ks[5], h2, 2)
    return w1, b1, w2, b2, w3, b3


def reference_forward(x, w1, b1, w2, b2, w3, b3):
    h = jnp.maximum(x @ w1 + b1, 0.0)
    h = jnp.maximum(h @ w2 + b2, 0.0)
    return h @ w3 + b3


if __name__ == "__main__":
    key = jax.random.PRNGKey(0)
    embed_dim, h1, h2 = 32, 64, 32

    kx, kp, kx2 = jax.random.split(key, 3)
    params = init_params(kp, embed_dim, h1, h2)

    # Small batch (single ragged tile; auto block_b path).
    B_small = 8
    x_small = jax.random.normal(kx, (B_small, embed_dim), jnp.float32)
    out_small = jax.block_until_ready(domain_classifier_forward(x_small, *params))
    ref_small = reference_forward(x_small, *params)
    assert out_small.shape == (B_small, 2), out_small.shape
    assert jnp.allclose(out_small, ref_small, atol=5e-2, rtol=5e-2), "mismatch (small batch)"

    # Multi-step grid with a ragged last block (1000 = 3*256 + 232), bf16 matmuls.
    B_big = 1000
    x_big = jax.random.normal(kx2, (B_big, embed_dim), jnp.float32)
    out_big = jax.block_until_ready(
        domain_classifier_forward(x_big, *params, block_b=256))
    ref_big = reference_forward(x_big, *params)
    assert out_big.shape == (B_big, 2), out_big.shape
    assert jnp.allclose(out_big, ref_big, atol=5e-2, rtol=5e-2), "mismatch (tiled batch)"

    # f32 matmul path: bit-close parity with the reference.
    out_f32 = jax.block_until_ready(
        domain_classifier_forward(x_big, *params, block_b=256,
                                  matmul_dtype=jnp.float32))
    assert jnp.allclose(out_f32, ref_big, atol=1e-5, rtol=1e-5), "mismatch (f32 path)"

    print("KERNEL_OK")
</pallas_src>

<mosaic_0001>
module attributes {stable_mosaic.version = 11 : i64} {
  func.func @_mlp_kernel(%arg0: i32, %arg1: memref<512x32xf32, #tpu.memory_space<vmem>>, %arg2: memref<32x64xbf16, #tpu.memory_space<vmem>>, %arg3: memref<1x64xf32, #tpu.memory_space<vmem>>, %arg4: memref<64x32xbf16, #tpu.memory_space<vmem>>, %arg5: memref<1x32xf32, #tpu.memory_space<vmem>>, %arg6: memref<32x2xbf16, #tpu.memory_space<vmem>>, %arg7: memref<1x2xf32, #tpu.memory_space<vmem>>, %arg8: memref<512x2xf32, #tpu.memory_space<vmem>>) attributes {dimension_semantics = [#tpu.dimension_semantics<parallel>], iteration_bounds = array<i64: 1>, scalar_prefetch = 0 : i64, scratch_operands = 0 : i64, tpu.core_type = #tpu.core_type<tc>, window_params = [{transform_indices = @transform_0, window_bounds = array<i64: 512, 32>}, {pipeline_mode = #tpu.pipeline_mode<synchronous>, transform_indices = @transform_1, window_bounds = array<i64: 32, 64>}, {pipeline_mode = #tpu.pipeline_mode<synchronous>, transform_indices = @transform_2, window_bounds = array<i64: 1, 64>}, {pipeline_mode = #tpu.pipeline_mode<synchronous>, transform_indices = @transform_3, window_bounds = array<i64: 64, 32>}, {pipeline_mode = #tpu.pipeline_mode<synchronous>, transform_indices = @transform_4, window_bounds = array<i64: 1, 32>}, {pipeline_mode = #tpu.pipeline_mode<synchronous>, transform_indices = @transform_5, window_bounds = array<i64: 32, 2>}, {pipeline_mode = #tpu.pipeline_mode<synchronous>, transform_indices = @transform_6, window_bounds = array<i64: 1, 2>}, {transform_indices = @transform_7, window_bounds = array<i64: 512, 2>}]} {
    %c0 = arith.constant 0 : index
    %c0_0 = arith.constant 0 : index
    %0 = vector.load %arg1[%c0, %c0_0] : memref<512x32xf32, #tpu.memory_space<vmem>>, vector<512x32xf32>
    %1 = arith.truncf %0 : vector<512x32xf32> to vector<512x32xbf16>
    %c0_1 = arith.constant 0 : index
    %c0_2 = arith.constant 0 : index
    %2 = vector.load %arg2[%c0_1, %c0_2] : memref<32x64xbf16, #tpu.memory_space<vmem>>, vector<32x64xbf16>
    %cst = arith.constant dense<0.000000e+00> : vector<512x64xf32>
    %3 = tpu.matmul %1, %2, %cst {dimension_numbers = #tpu.dot_dimension_numbers<[1], [0], [0], [1], [0, 0, 1, 1], [], []>} : vector<512x32xbf16>, vector<32x64xbf16>, vector<512x64xf32> -> vector<512x64xf32>
    %c0_3 = arith.constant 0 : index
    %c0_4 = arith.constant 0 : index
    %4 = vector.load %arg3[%c0_3, %c0_4] : memref<1x64xf32, #tpu.memory_space<vmem>>, vector<1x64xf32>
    %5 = vector.broadcast %4 : vector<1x64xf32> to vector<512x64xf32>
    %6 = arith.addf %3, %5 : vector<512x64xf32>
    %cst_5 = arith.constant 0.000000e+00 : f32
    %7 = vector.broadcast %cst_5 : f32 to vector<512x64xf32>
    %8 = arith.maximumf %6, %7 : vector<512x64xf32>
    %9 = arith.truncf %8 : vector<512x64xf32> to vector<512x64xbf16>
    %c0_6 = arith.constant 0 : index
    %c0_7 = arith.constant 0 : index
    %10 = vector.load %arg4[%c0_6, %c0_7] : memref<64x32xbf16, #tpu.memory_space<vmem>>, vector<64x32xbf16>
    %cst_8 = arith.constant dense<0.000000e+00> : vector<512x32xf32>
    %11 = tpu.matmul %9, %10, %cst_8 {dimension_numbers = #tpu.dot_dimension_numbers<[1], [0], [0], [1], [0, 0, 1, 1], [], []>} : vector<512x64xbf16>, vector<64x32xbf16>, vector<512x32xf32> -> vector<512x32xf32>
    %c0_9 = arith.constant 0 : index
    %c0_10 = arith.constant 0 : index
    %12 = vector.load %arg5[%c0_9, %c0_10] : memref<1x32xf32, #tpu.memory_space<vmem>>, vector<1x32xf32>
    %13 = vector.broadcast %12 : vector<1x32xf32> to vector<512x32xf32>
    %14 = arith.addf %11, %13 : vector<512x32xf32>
    %cst_11 = arith.constant 0.000000e+00 : f32
    %15 = vector.broadcast %cst_11 : f32 to vector<512x32xf32>
    %16 = arith.maximumf %14, %15 : vector<512x32xf32>
    %17 = arith.truncf %16 : vector<512x32xf32> to vector<512x32xbf16>
    %c0_12 = arith.constant 0 : index
    %c0_13 = arith.constant 0 : index
    %18 = vector.load %arg6[%c0_12, %c0_13] : memref<32x2xbf16, #tpu.memory_space<vmem>>, vector<32x2xbf16>
    %cst_14 = arith.constant dense<0.000000e+00> : vector<512x2xf32>
    %19 = tpu.matmul %17, %18, %cst_14 {dimension_numbers = #tpu.dot_dimension_numbers<[1], [0], [0], [1], [0, 0, 1, 1], [], []>} : vector<512x32xbf16>, vector<32x2xbf16>, vector<512x2xf32> -> vector<512x2xf32>
    %c0_15 = arith.constant 0 : index
    %c0_16 = arith.constant 0 : index
    %20 = vector.load %arg7[%c0_15, %c0_16] : memref<1x2xf32, #tpu.memory_space<vmem>>, vector<1x2xf32>
    %21 = vector.broadcast %20 : vector<1x2xf32> to vector<512x2xf32>
    %22 = arith.addf %19, %21 : vector<512x2xf32>
    %c0_17 = arith.constant 0 : index
    %c0_18 = arith.constant 0 : index
    %23 = vector.load %arg8[%c0_17, %c0_18] : memref<512x2xf32, #tpu.memory_space<vmem>>, vector<512x2xf32>
    tpu.vector_store %arg8[%c0_17, %c0_18], %22 {strides = array<i32>} : memref<512x2xf32, #tpu.memory_space<vmem>>, vector<512x2xf32>,
    return
  }
  func.func @transform_0(%arg0: i32) -> (i32, i32) {
    %c0_i32 = arith.constant 0 : i32
    %c0_i32_0 = arith.constant 0 : i32
    return %arg0, %c0_i32 : i32, i32
  }
  func.func @transform_1(%arg0: i32) -> (i32, i32) {
    %c0_i32 = arith.constant 0 : i32
    %c0_i32_0 = arith.constant 0 : i32
    %c0_i32_1 = arith.constant 0 : i32
    return %c0_i32, %c0_i32_0 : i32, i32
  }
  func.func @transform_2(%arg0: i32) -> (i32, i32) {
    %c0_i32 = arith.constant 0 : i32
    %c0_i32_0 = arith.constant 0 : i32
    %c0_i32_1 = arith.constant 0 : i32
    return %c0_i32, %c0_i32_0 : i32, i32
  }
  func.func @transform_3(%arg0: i32) -> (i32, i32) {
    %c0_i32 = arith.constant 0 : i32
    %c0_i32_0 = arith.constant 0 : i32
    %c0_i32_1 = arith.constant 0 : i32
    return %c0_i32, %c0_i32_0 : i32, i32
  }
  func.func @transform_4(%arg0: i32) -> (i32, i32) {
    %c0_i32 = arith.constant 0 : i32
    %c0_i32_0 = arith.constant 0 : i32
    %c0_i32_1 = arith.constant 0 : i32
    return %c0_i32, %c0_i32_0 : i32, i32
  }
  func.func @transform_5(%arg0: i32) -> (i32, i32) {
    %c0_i32 = arith.constant 0 : i32
    %c0_i32_0 = arith.constant 0 : i32
    %c0_i32_1 = arith.constant 0 : i32
    return %c0_i32, %c0_i32_0 : i32, i32
  }
  func.func @transform_6(%arg0: i32) -> (i32, i32) {
    %c0_i32 = arith.constant 0 : i32
    %c0_i32_0 = arith.constant 0 : i32
    %c0_i32_1 = arith.constant 0 : i32
    return %c0_i32, %c0_i32_0 : i32, i32
  }
  func.func @transform_7(%arg0: i32) -> (i32, i32) {
    %c0_i32 = arith.constant 0 : i32
    %c0_i32_0 = arith.constant 0 : i32
    return %arg0, %c0_i32 : i32, i32
  }
}

</mosaic_0001>

<bundles_post_ra>
// kernel: _domain_classifier_pallas.1
= control target key start
LH: loop header
LB: loop body
LE: loop exit
PB: predicated region body
PF: predicated region fallthrough
CT: control target
= control target key end

     0   :  { %vm146_vm0 = vcmask 261120   ;;  %vm667_vm1 = vcmask 523264   ;;  %vm1557_vm2 = vcmask 15360   ;;  %s2650_s0 = inlined_call_operand.vmem [shape: f32[8,32], index: 0, kind: input, shape index: {}]   ;;  %s2651_s1 = inlined_call_operand.vmem [shape: bf16[32,64], index: 1, kind: input, shape index: {}]   ;;  %s2652_s2 = inlined_call_operand.vmem [shape: f32[1,64], index: 2, kind: input, shape index: {}]   ;;  %s2653_s3 = inlined_call_operand.vmem [shape: bf16[64,32], index: 3, kind: input, shape index: {}]   ;;  %s2654_s4 = inlined_call_operand.vmem [shape: f32[1,32], index: 4, kind: input, shape index: {}]   ;;  %s2655_s5 = inlined_call_operand.vmem [shape: bf16[32,2], index: 5, kind: input, shape index: {}]   ;;  %s2656_s6 = inlined_call_operand.vmem [shape: f32[1,2], index: 6, kind: input, shape index: {}]   ;;  %s2657_s7 = inlined_call_operand.vmem [shape: f32[8,2], index: 7, kind: output, shape index: {}]  }
   0x1   :  { %v2086_v0 = vld [vmem:[%s2651_s1 + $0x8] sm:$0xff]   ;;  %v2087_v1 = vld [vmem:[%s2651_s1] sm:$0xff]   ;;  %v29_v5 = vld [vmem:[%s2650_s0 + $0x10] sm:$0xff] }
   0x2   :  { %1874 = vmatprep.subr.bf16.mxu0 %v2086_v0  ;;  %v27_v2 = vld [vmem:[%s2650_s0] sm:$0xff]  ;;  %v28_v3 = vld [vmem:[%s2650_s0 + $0x8] sm:$0xff]  ;;  %2082 = vmatprep.subr.bf16.mxu1 %v2086_v0  ;;  %v30_v6 = vld [vmem:[%s2650_s0 + $0x18] sm:$0xff] }
   0x3   :  { %1875 = vmatpush3.bf16.msra.mxu0 %v2086_v0  ;;  %v91_v4 = vpack.c.bf16 %v28_v3, %v27_v2  ;;  %2084 = vmatpush3.bf16.msra.mxu1 %v2086_v0  ;;  %v31_v7 = vld [vmem:[%s2650_s0 + $0x20] sm:$0xff]  ;;  %v32_v8 = vld [vmem:[%s2650_s0 + $0x28] sm:$0xff]  ;;  %v92_v9 = vpack.c.bf16 %v30_v6, %v29_v5  ;;  %v33_v11 = vld [vmem:[%s2650_s0 + $0x30] sm:$0xff] }
   0x4   :  { %1876 = vmatprep.subr.bf16.mxu0 %v2087_v1  ;;  %2083 = vmatprep.subr.bf16.mxu1 %v2087_v1  ;;  %v93_v10 = vpack.c.bf16 %v32_v8, %v31_v7  ;;  %v34_v12 = vld [vmem:[%s2650_s0 + $0x38] sm:$0xff]  ;;  %v35_v13 = vld [vmem:[%s2650_s0 + $0x40] sm:$0xff]  ;;  %v36_v14 = vld [vmem:[%s2650_s0 + $0x48] sm:$0xff] }
   0x5   :  { %1878 = vmatprep.mubr.msk.bf16.mxu0 %vm146_vm0, %v91_v4  ;;  %v59_v15 = vld [vmem:[%s2650_s0 + $0x100] sm:$0xff]  ;;  %v60_v16 = vld [vmem:[%s2650_s0 + $0x108] sm:$0xff]  ;;  %v61_v17 = vld [vmem:[%s2650_s0 + $0x110] sm:$0xff]  ;;  %v94_v19 = vpack.c.bf16 %v34_v12, %v33_v11  ;;  %v95_v24 = vpack.c.bf16 %v36_v14, %v35_v13 }
   0x6   :  { %v62_v18 = vld [vmem:[%s2650_s0 + $0x118] sm:$0xff]  ;;  %v107_v20 = vpack.c.bf16 %v60_v16, %v59_v15  ;;  %v63_v22 = vld [vmem:[%s2650_s0 + $0x120] sm:$0xff]  ;;  %v64_v23 = vld [vmem:[%s2650_s0 + $0x128] sm:$0xff] }
   0x7   :  { %1877 = vmatpush3.bf16.msra.mxu0 %v2087_v1  ;;  %2085 = vmatpush3.bf16.msra.mxu1 %v2087_v1  ;;  %v108_v21 = vpack.c.bf16 %v62_v18, %v61_v17  ;;  %v109_v25 = vpack.c.bf16 %v64_v23, %v63_v22  ;;  %v37_v26 = vld [vmem:[%s2650_s0 + $0x50] sm:$0xff]  ;;  %v66_v28 = vld [vmem:[%s2650_s0 + $0x138] sm:$0xff]  ;;  %v67_v30 = vld [vmem:[%s2650_s0 + $0x140] sm:$0xff] }
   0x8   :  { %1910 = vmatprep.mubr.msk.bf16.mxu1 %vm146_vm0, %v107_v20  ;;  %v65_v27 = vld [vmem:[%s2650_s0 + $0x130] sm:$0xff]  ;;  %v38_v29 = vld [vmem:[%s2650_s0 + $0x58] sm:$0xff]  ;;  %v68_v31 = vld [vmem:[%s2650_s0 + $0x148] sm:$0xff] }
   0x9   :  { %v39_v32 = vld [vmem:[%s2650_s0 + $0x60] sm:$0xff]  ;;  %v40_v33 = vld [vmem:[%s2650_s0 + $0x68] sm:$0xff]  ;;  %v110_v34 = vpack.c.bf16 %v66_v28, %v65_v27  ;;  %v96_v35 = vpack.c.bf16 %v38_v29, %v37_v26  ;;  %v111_v36 = vpack.c.bf16 %v68_v31, %v67_v30  ;;  %v69_v38 = vld [vmem:[%s2650_s0 + $0x150] sm:$0xff] }
   0xa   :  { %1879 = vmatmul.mubr.msk.bf16.vlgmr.msra.gmra.mxu0 %vm146_vm0, %v92_v9  ;;  %1911 = vmatmul.mubr.msk.bf16.vlgmr.msra.gmra.mxu1 %vm146_vm0, %v108_v21  ;;  %v97_v37 = vpack.c.bf16 %v40_v33, %v39_v32  ;;  %v70_v39 = vld [vmem:[%s2650_s0 + $0x158] sm:$0xff]  ;;  %v41_v41 = vld [vmem:[%s2650_s0 + $0x70] sm:$0xff]  ;;  %v43_v44 = vld [vmem:[%s2650_s0 + $0x80] sm:$0xff] }
   0xb   :  { %1882 = vmatprep.mubr.msk.bf16.mxu0 %vm146_vm0, %v93_v10  ;;  %1914 = vmatprep.mubr.msk.bf16.mxu1 %vm146_vm0, %v109_v25  ;;  %v2088_v40 = vld [vmem:[%s2653_s3 + $0x18] sm:$0xff]   ;;  %v2089_v43 = vld [vmem:[%s2653_s3 + $0x10] sm:$0xff]   ;;  %v71_v45 = vld [vmem:[%s2650_s0 + $0x160] sm:$0xff]  ;;  %v112_v48 = vpack.c.bf16 %v70_v39, %v69_v38 }
   0xc   :  { %v42_v42 = vld [vmem:[%s2650_s0 + $0x78] sm:$0xff]  ;;  %v72_v46 = vld [vmem:[%s2650_s0 + $0x168] sm:$0xff]  ;;  %1942 = vmatprep.subr.bf16.mxu1 %v2088_v40  ;;  %v2091_v53 = vld [vmem:[%s2653_s3] sm:$0xff]  }
   0xd   :  { %v44_v47 = vld [vmem:[%s2650_s0 + $0x88] sm:$0xff]  ;;  %1943 = vmatpush3.bf16.msra.mxu1 %v2088_v40  ;;  %v98_v50 = vpack.c.bf16 %v42_v42, %v41_v41  ;;  %v113_v51 = vpack.c.bf16 %v72_v46, %v71_v45  ;;  %v45_v54 = vld [vmem:[%s2650_s0 + $0x90] sm:$0xff]  ;;  %v74_v56 = vld [vmem:[%s2650_s0 + $0x178] sm:$0xff] }
   0xe   :  { %1944 = vmatprep.subr.bf16.mxu1 %v2089_v43  ;;  %v2090_v49 = vld [vmem:[%s2653_s3 + $0x8] sm:$0xff]   ;;  %v99_v52 = vpack.c.bf16 %v44_v47, %v43_v44  ;;  %v73_v55 = vld [vmem:[%s2650_s0 + $0x170] sm:$0xff]  ;;  %v46_v57 = vld [vmem:[%s2650_s0 + $0x98] sm:$0xff] }
   0xf   :  { %v75_v58 = vld [vmem:[%s2650_s0 + $0x180] sm:$0xff]  ;;  %v76_v59 = vld [vmem:[%s2650_s0 + $0x188] sm:$0xff]  ;;  %v114_v62 = vpack.c.bf16 %v74_v56, %v73_v55  ;;  %v100_v63 = vpack.c.bf16 %v46_v57, %v45_v54  ;;  %v49_v2 = vld [vmem:[%s2650_s0 + $0xb0] sm:$0xff] }
  0x10   :  { %v47_v60 = vld [vmem:[%s2650_s0 + $0xa0] sm:$0xff]  ;;  %v48_v61 = vld [vmem:[%s2650_s0 + $0xa8] sm:$0xff]  ;;  %v115_v0 = vpack.c.bf16 %v76_v59, %v75_v58  ;;  %v77_v3 = vld [vmem:[%s2650_s0 + $0x190] sm:$0xff] }
  0x11   :  { %1945 = vmatpush3.bf16.msra.mxu1 %v2089_v43  ;;  %v101_v1 = vpack.c.bf16 %v48_v61, %v47_v60  ;;  %v78_v4 = vld [vmem:[%s2650_s0 + $0x198] sm:$0xff]  ;;  %v79_v6 = vld [vmem:[%s2650_s0 + $0x1a0] sm:$0xff]  ;;  %v80_v7 = vld [vmem:[%s2650_s0 + $0x1a8] sm:$0xff] }
  0x12   :  { %1883 = vmatmul.mubr.msk.bf16.gmra.mxu0 %vm146_vm0, %v94_v19  ;;  %1915 = vmatmul.mubr.msk.bf16.gmra.mxu1 %vm146_vm0, %v110_v34  ;;  %v50_v5 = vld [vmem:[%s2650_s0 + $0xb8] sm:$0xff]  ;;  %v51_v8 = vld [vmem:[%s2650_s0 + $0xc0] sm:$0xff]  ;;  %v52_v9 = vld [vmem:[%s2650_s0 + $0xc8] sm:$0xff]  ;;  %v116_v10 = vpack.c.bf16 %v78_v4, %v77_v3  ;;  %v117_v12 = vpack.c.bf16 %v80_v7, %v79_v6 }
  0x13   :  { %1886 = vmatprep.mubr.msk.bf16.mxu0 %vm146_vm0, %v95_v24  ;;  %1918 = vmatprep.mubr.msk.bf16.mxu1 %vm146_vm0, %v111_v36  ;;  %v102_v11 = vpack.c.bf16 %v50_v5, %v49_v2  ;;  %v103_v13 = vpack.c.bf16 %v52_v9, %v51_v8  ;;  %v53_v14 = vld [vmem:[%s2650_s0 + $0xd0] sm:$0xff]  ;;  %v82_v16 = vld [vmem:[%s2650_s0 + $0x1b8] sm:$0xff]  ;;  %v83_v18 = vld [vmem:[%s2650_s0 + $0x1c0] sm:$0xff] }
  0x14   :  { %1946 = vmatprep.subr.bf16.mxu1 %v2090_v49  ;;  %v81_v15 = vld [vmem:[%s2650_s0 + $0x1b0] sm:$0xff]  ;;  %v54_v17 = vld [vmem:[%s2650_s0 + $0xd8] sm:$0xff]  ;;  %v84_v19 = vld [vmem:[%s2650_s0 + $0x1c8] sm:$0xff] }
  0x15   :  { %1947 = vmatpush3.bf16.msra.mxu1 %v2090_v49  ;;  %v55_v20 = vld [vmem:[%s2650_s0 + $0xe0] sm:$0xff]  ;;  %v56_v21 = vld [vmem:[%s2650_s0 + $0xe8] sm:$0xff]  ;;  %v118_v22 = vpack.c.bf16 %v82_v16, %v81_v15  ;;  %v104_v23 = vpack.c.bf16 %v54_v17, %v53_v14  ;;  %v119_v24 = vpack.c.bf16 %v84_v19, %v83_v18  ;;  %v57_v26 = vld [vmem:[%s2650_s0 + $0xf0] sm:$0xff] }
  0x16   :  { %1948 = vmatprep.subr.bf16.mxu1 %v2091_v53  ;;  %v105_v25 = vpack.c.bf16 %v56_v21, %v55_v20  ;;  %v85_v27 = vld [vmem:[%s2650_s0 + $0x1d0] sm:$0xff]  ;;  %v86_v28 = vld [vmem:[%s2650_s0 + $0x1d8] sm:$0xff]  ;;  %v87_v30 = vld [vmem:[%s2650_s0 + $0x1e0] sm:$0xff] }
  0x17   :  { %v58_v29 = vld [vmem:[%s2650_s0 + $0xf8] sm:$0xff]  ;;  %v88_v31 = vld [vmem:[%s2650_s0 + $0x1e8] sm:$0xff]  ;;  %v120_v32 = vpack.c.bf16 %v86_v28, %v85_v27  ;;  %v2379_v40 = vld [vmem:[%s2652_s2] ss:$0 sm:$0xff] }
  0x18   :  { %v106_v33 = vpack.c.bf16 %v58_v29, %v57_v26  ;;  %v121_v34 = vpack.c.bf16 %v88_v31, %v87_v30  ;;  %v90_v36 = vld [vmem:[%s2650_s0 + $0x1f8] sm:$0xff]  ;;  %v2092_v46 = vld [vmem:[%s2655_s5 + $0x8] sm:$0xff]   ;;  %v2093_v47 = vld [vmem:[%s2655_s5] sm:$0xff]  }
  0x19   :  { %1949 = vmatpush3.bf16.msra.mxu1 %v2091_v53  ;;  %2014 = vmatprep.subr.bf16.mxu0 %v2092_v46 }
  0x1a   :  { %1887 = vmatmul.mubr.msk.bf16.gmra.mxu0 %vm146_vm0, %v96_v35  ;;  %1919 = vmatmul.mubr.msk.bf16.gmra.mxu1 %vm146_vm0, %v112_v48  ;;  %v89_v35 = vld [vmem:[%s2650_s0 + $0x1f0] sm:$0xff] }
  0x1b   :  { %1890 = vmatprep.mubr.msk.bf16.mxu0 %vm146_vm0, %v97_v37  ;;  %1922 = vmatprep.mubr.msk.bf16.mxu1 %vm146_vm0, %v113_v51  ;;  %v122_v37 = vpack.c.bf16 %v90_v36, %v89_v35 }
  0x1c   :  { %2015 = vmatpush3.bf16.msra.mxu0 %v2092_v46 }
  0x1d   :  { %2016 = vmatprep.subr.bf16.mxu0 %v2093_v47 }
  0x20   :  { %2017 = vmatpush3.bf16.msra.mxu0 %v2093_v47 }
  0x22   :  { %1891 = vmatmul.mubr.msk.bf16.gmra.mxu0 %vm146_vm0, %v98_v50  ;;  %1923 = vmatmul.mubr.msk.bf16.gmra.mxu1 %vm146_vm0, %v114_v62 }
  0x23   :  { %1894 = vmatprep.mubr.msk.bf16.mxu0 %vm146_vm0, %v99_v52  ;;  %1926 = vmatprep.mubr.msk.bf16.mxu1 %vm146_vm0, %v115_v0 }
  0x2a   :  { %1895 = vmatmul.mubr.msk.bf16.gmra.mxu0 %vm146_vm0, %v100_v63  ;;  %1927 = vmatmul.mubr.msk.bf16.gmra.mxu1 %vm146_vm0, %v116_v10 }
  0x2b   :  { %1898 = vmatprep.mubr.msk.bf16.mxu0 %vm146_vm0, %v101_v1  ;;  %1930 = vmatprep.mubr.msk.bf16.mxu1 %vm146_vm0, %v117_v12 }
  0x32   :  { %1899 = vmatmul.mubr.msk.bf16.gmra.mxu0 %vm146_vm0, %v102_v11  ;;  %1931 = vmatmul.mubr.msk.bf16.gmra.mxu1 %vm146_vm0, %v118_v22 }
  0x33   :  { %1902 = vmatprep.mubr.msk.bf16.mxu0 %vm146_vm0, %v103_v13  ;;  %1934 = vmatprep.mubr.msk.bf16.mxu1 %vm146_vm0, %v119_v24 }
  0x3a   :  { %1903 = vmatmul.mubr.msk.bf16.gmra.mxu0 %vm146_vm0, %v104_v23  ;;  %1935 = vmatmul.mubr.msk.bf16.gmra.mxu1 %vm146_vm0, %v120_v32 }
  0x3b   :  { %1906 = vmatprep.mubr.msk.bf16.mxu0 %vm146_vm0, %v105_v25  ;;  %1938 = vmatprep.mubr.msk.bf16.mxu1 %vm146_vm0, %v121_v34 }
  0x42   :  { %1907 = vmatmul.mubr.msk.bf16.gmra.mxu0 %vm146_vm0, %v106_v33  ;;  %1939 = vmatmul.mubr.msk.bf16.gmra.mxu1 %vm146_vm0, %v122_v37 }
  0xca   :  { %v1880_v38 = vpop.f32.mrf.mxu0  ;;  %v2391_v49 = vpop.f32.mrf.mxu1 }
  0xcb   :  { %v286_v44 = vadd.f32 %v1880_v38, %v2379_v40 }
  0xcc   :  { %v277_v39 = vpop.f32.mrf.mxu0  ;;  %v2393_v54 = vpop.f32.mrf.mxu1 }
  0xcd   :  { %v278_v42 = vadd.f32 %v2379_v40, %v277_v39  ;;  %v534_v55 = vmax.f32 %v286_v44, 0.0 }
  0xce   :  { %v1881_v41 = vpop.f32.mrf.mxu0  ;;  %v2395_v58 = vpop.f32.mrf.mxu1 }
  0xcf   :  { %v289_v43 = vadd.f32 %v1881_v41, %v2379_v40  ;;  %v532_v52 = vmax.f32 %v278_v42, 0.0 }
  0xd0   :  { %v280_v45 = vpop.f32.mrf.mxu0  ;;  %v2400_v63 = vpop.f32.mrf.mxu1 }
  0xd1   :  { %v281_v48 = vadd.f32 %v2379_v40, %v280_v45  ;;  %v535_v50 = vmax.f32 %v289_v43, 0.0 }
  0xd2   :  { %v1884_v51 = vpop.f32.mrf.mxu0  ;;  %v2405_v3 = vpop.f32.mrf.mxu1 }
  0xd3   :  { %v533_v53 = vmax.f32 %v281_v48, 0.0  ;;  %v597_v59 = vpack.c.bf16 %v535_v50, %v534_v55  ;;  %v302_v0 = vadd.f32 %v1884_v51, %v2379_v40 }
  0xd4   :  { %v293_v56 = vpop.f32.mrf.mxu0  ;;  %v2407_v8 = vpop.f32.mrf.mxu1 }
  0xd5   :  { %v596_v57 = vpack.c.bf16 %v533_v53, %v532_v52  ;;  %v294_v61 = vadd.f32 %v2379_v40, %v293_v56  ;;  %v538_v9 = vmax.f32 %v302_v0, 0.0 }
  0xd6   :  { %v1885_v60 = vpop.f32.mrf.mxu0  ;;  %v2409_v12 = vpop.f32.mrf.mxu1 }
  0xd7   :  { %v305_v62 = vadd.f32 %v1885_v60, %v2379_v40  ;;  %1950 = vmatprep.mubr.msk.bf16.mxu1 %vm667_vm1, %v596_v57  ;;  %v536_v6 = vmax.f32 %v294_v61, 0.0 }
  0xd8   :  { %v296_v1 = vpop.f32.mrf.mxu0  ;;  %1951 = vmatmul.mubr.msk.bf16.vlgmr.msra.gmra.mxu1 %vm667_vm1, %v597_v59  ;;  %v2414_v17 = vpop.f32.mrf.mxu1 }
  0xd9   :  { %v297_v2 = vadd.f32 %v2379_v40, %v296_v1  ;;  %v539_v4 = vmax.f32 %v305_v62, 0.0 }
  0xda   :  { %v1888_v5 = vpop.f32.mrf.mxu0  ;;  %v2419_v21 = vpop.f32.mrf.mxu1 }
  0xdb   :  { %v537_v7 = vmax.f32 %v297_v2, 0.0  ;;  %v599_v13 = vpack.c.bf16 %v539_v4, %v538_v9  ;;  %v318_v18 = vadd.f32 %v1888_v5, %v2379_v40 }
  0xdc   :  { %v309_v10 = vpop.f32.mrf.mxu0  ;;  %v2421_v26 = vpop.f32.mrf.mxu1 }
  0xdd   :  { %v598_v11 = vpack.c.bf16 %v537_v7, %v536_v6  ;;  %v310_v15 = vadd.f32 %v2379_v40, %v309_v10  ;;  %v542_v27 = vmax.f32 %v318_v18, 0.0 }
  0xde   :  { %v1889_v14 = vpop.f32.mrf.mxu0  ;;  %v2423_v32 = vpop.f32.mrf.mxu1 }
  0xdf   :  { %v321_v16 = vadd.f32 %v1889_v14, %v2379_v40  ;;  %1954 = vmatprep.mubr.msk.bf16.mxu1 %vm667_vm1, %v598_v11  ;;  %v540_v24 = vmax.f32 %v310_v15, 0.0 }
  0xe0   :  { %v312_v19 = vpop.f32.mrf.mxu0  ;;  %1955 = vmatmul.mubr.msk.bf16.gmra.mxu1 %vm667_vm1, %v599_v13  ;;  %v2431_v41 = vpop.f32.mrf.mxu1 }
  0xe1   :  { %v313_v20 = vadd.f32 %v2379_v40, %v312_v19  ;;  %v543_v22 = vmax.f32 %v321_v16, 0.0 }
  0xe2   :  { %v1892_v23 = vpop.f32.mrf.mxu0  ;;  %v2433_v50 = vpop.f32.mrf.mxu1 }
  0xe3   :  { %v541_v25 = vmax.f32 %v313_v20, 0.0  ;;  %v601_v30 = vpack.c.bf16 %v543_v22, %v542_v27  ;;  %v334_v35 = vadd.f32 %v1892_v23, %v2379_v40 }
  0xe4   :  { %v325_v28 = vpop.f32.mrf.mxu0  ;;  %v2441_v60 = vpop.f32.mrf.mxu1 }
  0xe5   :  { %v600_v29 = vpack.c.bf16 %v541_v25, %v540_v24  ;;  %v326_v33 = vadd.f32 %v2379_v40, %v325_v28  ;;  %v546_v44 = vmax.f32 %v334_v35, 0.0 }
  0xe6   :  { %v1893_v31 = vpop.f32.mrf.mxu0  ;;  %v2443_v6 = vpop.f32.mrf.mxu1 }
  0xe7   :  { %v337_v34 = vadd.f32 %v1893_v31, %v2379_v40  ;;  %1958 = vmatprep.mubr.msk.bf16.mxu1 %vm667_vm1, %v600_v29  ;;  %v544_v42 = vmax.f32 %v326_v33, 0.0 }
  0xe8   :  { %v328_v36 = vpop.f32.mrf.mxu0  ;;  %1959 = vmatmul.mubr.msk.bf16.gmra.mxu1 %vm667_vm1, %v601_v30  ;;  %v2451_v16 = vpop.f32.mrf.mxu1 }
  0xe9   :  { %v329_v37 = vadd.f32 %v2379_v40, %v328_v36  ;;  %v547_v38 = vmax.f32 %v337_v34, 0.0 }
  0xea   :  { %v1896_v39 = vpop.f32.mrf.mxu0  ;;  %v2453_v27 = vpop.f32.mrf.mxu1 }
  0xeb   :  { %v545_v43 = vmax.f32 %v329_v37, 0.0  ;;  %v603_v47 = vpack.c.bf16 %v547_v38, %v546_v44  ;;  %v350_v53 = vadd.f32 %v1896_v39, %v2379_v40  ;;  %v406_v44 = vadd.f32 %v2379_v40, %v2393_v54 }
  0xec   :  { %v341_v45 = vpop.f32.mrf.mxu0  ;;  %v2461_v36 = vpop.f32.mrf.mxu1 }
  0xed   :  { %v602_v46 = vpack.c.bf16 %v545_v43, %v544_v42  ;;  %v342_v51 = vadd.f32 %v2379_v40, %v341_v45  ;;  %v550_v0 = vmax.f32 %v350_v53, 0.0  ;;  %v409_v45 = vadd.f32 %v2379_v40, %v2400_v63 }
  0xee   :  { %v1897_v48 = vpop.f32.mrf.mxu0 }
  0xef   :  { %v353_v52 = vadd.f32 %v1897_v48, %v2379_v40  ;;  %1962 = vmatprep.mubr.msk.bf16.mxu1 %vm667_vm1, %v602_v46  ;;  %v548_v61 = vmax.f32 %v342_v51, 0.0  ;;  %v2467_v48 = vpop.f32.mrf.mxu1 }
  0xf0   :  { %v344_v55 = vpop.f32.mrf.mxu0  ;;  %1963 = vmatmul.mubr.msk.bf16.gmra.mxu1 %vm667_vm1, %v603_v47 }
  0xf1   :  { %v345_v56 = vadd.f32 %v2379_v40, %v344_v55  ;;  %v551_v57 = vmax.f32 %v353_v52, 0.0 }
  0xf2   :  { %v1900_v59 = vpop.f32.mrf.mxu0 }
  0xf3   :  { %v549_v62 = vmax.f32 %v345_v56, 0.0  ;;  %v605_v4 = vpack.c.bf16 %v551_v57, %v550_v0  ;;  %v366_v10 = vadd.f32 %v1900_v59, %v2379_v40  ;;  %v564_v56 = vmax.f32 %v406_v44, 0.0  ;;  %v472_v59 = vpop.f32.mrf.mxu1 }
  0xf4   :  { %v357_v1 = vpop.f32.mrf.mxu0  ;;  %v565_v57 = vmax.f32 %v409_v45, 0.0  ;;  %v465_v44 = vadd.f32 %v2443_v6, %v2379_v40  ;;  %v481_v6 = vadd.f32 %v2467_v48, %v2379_v40 }
  0xf5   :  { %v604_v2 = vpack.c.bf16 %v549_v62, %v548_v61  ;;  %v358_v7 = vadd.f32 %v2379_v40, %v357_v1  ;;  %v554_v20 = vmax.f32 %v366_v10, 0.0  ;;  %v417_v10 = vadd.f32 %v2395_v58, %v2379_v40 }
  0xf6   :  { %v1901_v5 = vpop.f32.mrf.mxu0  ;;  %v441_v58 = vadd.f32 %v2379_v40, %v2431_v41  ;;  %v454_v41 = vadd.f32 %v2379_v40, %v2441_v60 }
  0xf7   :  { %v369_v9 = vadd.f32 %v1901_v5, %v2379_v40  ;;  %1966 = vmatprep.mubr.msk.bf16.mxu1 %vm667_vm1, %v604_v2  ;;  %v552_v18 = vmax.f32 %v358_v7, 0.0  ;;  %v612_v2 = vpack.c.bf16 %v565_v57, %v564_v56  ;;  %v425_v5 = vadd.f32 %v2379_v40, %v2414_v17 }
  0xf8   :  { %v360_v11 = vpop.f32.mrf.mxu0  ;;  %1967 = vmatmul.mubr.msk.bf16.gmra.mxu1 %vm667_vm1, %v605_v4  ;;  %v422_v4 = vadd.f32 %v2379_v40, %v2407_v8  ;;  %v414_v7 = vadd.f32 %v2391_v49, %v2379_v40  ;;  %v438_v49 = vadd.f32 %v2379_v40, %v2421_v26 }
  0xf9   :  { %v361_v13 = vadd.f32 %v2379_v40, %v360_v11  ;;  %v555_v14 = vmax.f32 %v369_v9, 0.0  ;;  %v2483_v11 = vpop.f32.mrf.mxu1  ;;  %v569_v8 = vmax.f32 %v425_v5, 0.0 }
  0xfa   :  { %v1904_v15 = vpop.f32.mrf.mxu0 }
  0xfb   :  { %v553_v19 = vmax.f32 %v361_v13, 0.0  ;;  %v607_v24 = vpack.c.bf16 %v555_v14, %v554_v20  ;;  %v382_v30 = vadd.f32 %v1904_v15, %v2379_v40  ;;  %v568_v13 = vmax.f32 %v422_v4, 0.0  ;;  %v485_v17 = vpop.f32.mrf.mxu1 }
  0xfc   :  { %v373_v22 = vpop.f32.mrf.mxu0  ;;  %v566_v14 = vmax.f32 %v414_v7, 0.0  ;;  %v567_v15 = vmax.f32 %v417_v10, 0.0  ;;  %v430_v20 = vadd.f32 %v2405_v3, %v2379_v40  ;;  %v457_v3 = vadd.f32 %v2379_v40, %v2451_v16 }
  0xfd   :  { %v606_v23 = vpack.c.bf16 %v553_v19, %v552_v18  ;;  %v374_v28 = vadd.f32 %v2379_v40, %v373_v22  ;;  %v558_v39 = vmax.f32 %v382_v30, 0.0  ;;  %v614_v18 = vpack.c.bf16 %v569_v8, %v568_v13 }
  0xfe   :  { %v1905_v25 = vpop.f32.mrf.mxu0  ;;  %v613_v19 = vpack.c.bf16 %v567_v15, %v566_v14  ;;  %v433_v22 = vadd.f32 %v2409_v12, %v2379_v40  ;;  %v446_v12 = vadd.f32 %v2419_v21, %v2379_v40  ;;  %v470_v16 = vadd.f32 %v2379_v40, %v2461_v36 }
  0xff   :  { %v385_v29 = vadd.f32 %v1905_v25, %v2379_v40  ;;  %1970 = vmatprep.mubr.msk.bf16.mxu1 %vm667_vm1, %v606_v23  ;;  %v556_v37 = vmax.f32 %v374_v28, 0.0  ;;  %v1933_v23 = vpop.f32.mrf.mxu1  ;;  %v573_v25 = vmax.f32 %v441_v58, 0.0  ;;  %v570_v28 = vmax.f32 %v430_v20, 0.0 }
 0x100   :  { %v376_v31 = vpop.f32.mrf.mxu0  ;;  %1971 = vmatmul.mubr.msk.bf16.gmra.mxu1 %vm667_vm1, %v607_v24  ;;  %v572_v24 = vmax.f32 %v438_v49, 0.0  ;;  %v497_v48 = vadd.f32 %v1933_v23, %v2379_v40 }
 0x101   :  { %v377_v33 = vadd.f32 %v2379_v40, %v376_v31  ;;  %v559_v34 = vmax.f32 %v385_v29, 0.0  ;;  %v571_v29 = vmax.f32 %v433_v22, 0.0  ;;  %v488_v26 = vpop.f32.mrf.mxu1 }
 0x102   :  { %v1908_v35 = vpop.f32.mrf.mxu0  ;;  %v616_v30 = vpack.c.bf16 %v573_v25, %v572_v24  ;;  %v489_v56 = vadd.f32 %v2379_v40, %v488_v26  ;;  %v587_v8 = vmax.f32 %v497_v48, 0.0 }
 0x103   :  { %v557_v38 = vmax.f32 %v377_v33, 0.0  ;;  %v609_v46 = vpack.c.bf16 %v559_v34, %v558_v39  ;;  %v398_v53 = vadd.f32 %v1908_v35, %v2379_v40  ;;  %v615_v31 = vpack.c.bf16 %v571_v29, %v570_v28  ;;  %v1936_v34 = vpop.f32.mrf.mxu1 }
 0x104   :  { %v389_v42 = vpop.f32.mrf.mxu0  ;;  %v449_v33 = vadd.f32 %v2423_v32, %v2379_v40  ;;  %v576_v35 = vmax.f32 %v454_v41, 0.0  ;;  %v462_v32 = vadd.f32 %v2433_v50, %v2379_v40  ;;  %v478_v50 = vadd.f32 %v2453_v27, %v2379_v40 }
 0x105   :  { %v608_v43 = vpack.c.bf16 %v557_v38, %v556_v37  ;;  %v390_v51 = vadd.f32 %v2379_v40, %v389_v42  ;;  %v562_v0 = vmax.f32 %v398_v53, 0.0  ;;  %v577_v37 = vmax.f32 %v457_v3, 0.0  ;;  %v501_v60 = vpop.f32.mrf.mxu1 }
 0x106   :  { %v1909_v47 = vpop.f32.mrf.mxu0  ;;  %v574_v38 = vmax.f32 %v446_v12, 0.0  ;;  %v575_v39 = vmax.f32 %v449_v33, 0.0  ;;  %v494_v27 = vadd.f32 %v2483_v11, %v2379_v40  ;;  %v510_v11 = vadd.f32 %v1936_v34, %v2379_v40  ;;  %v2546_v12 = vld [vmem:[%s2654_s4] ss:$0 sm:$0xff] }
 0x107   :  { %v401_v52 = vadd.f32 %v1909_v47, %v2379_v40  ;;  %1974 = vmatprep.mubr.msk.bf16.mxu1 %vm667_vm1, %v608_v43  ;;  %v560_v61 = vmax.f32 %v390_v51, 0.0  ;;  %v618_v42 = vpack.c.bf16 %v577_v37, %v576_v35  ;;  %v473_v43 = vadd.f32 %v2379_v40, %v472_v59  ;;  %v1937_v45 = vpop.f32.mrf.mxu1 }
 0x108   :  { %v392_v55 = vpop.f32.mrf.mxu0  ;;  %1975 = vmatmul.mubr.msk.bf16.gmra.mxu1 %vm667_vm1, %v609_v46  ;;  %v617_v21 = vpack.c.bf16 %v575_v39, %v574_v38  ;;  %v580_v46 = vmax.f32 %v470_v16, 0.0  ;;  %v578_v51 = vmax.f32 %v462_v32, 0.0  ;;  %v585_v59 = vmax.f32 %v489_v56, 0.0 }
 0x109   :  { %v393_v54 = vadd.f32 %v2379_v40, %v392_v55  ;;  %v563_v63 = vmax.f32 %v401_v52, 0.0  ;;  %v581_v47 = vmax.f32 %v473_v43, 0.0  ;;  %v579_v52 = vmax.f32 %v465_v44, 0.0  ;;  %v504_v53 = vpop.f32.mrf.mxu1 }
 0x10a   :  { %v486_v55 = vadd.f32 %v2379_v40, %v485_v17  ;;  %v505_v4 = vadd.f32 %v2379_v40, %v504_v53  ;;  %v586_v13 = vmax.f32 %v494_v27, 0.0  ;;  %v513_v58 = vadd.f32 %v1937_v45, %v2379_v40 }
 0x10b   :  { %v561_v62 = vmax.f32 %v393_v54, 0.0  ;;  %v611_v9 = vpack.c.bf16 %v563_v63, %v562_v0  ;;  %v620_v36 = vpack.c.bf16 %v581_v47, %v580_v46  ;;  %v619_v54 = vpack.c.bf16 %v579_v52, %v578_v51  ;;  %v1940_v57 = vpop.f32.mrf.mxu1 }
 0x10c   :  { %v584_v63 = vmax.f32 %v486_v55, 0.0  ;;  %v589_v10 = vmax.f32 %v505_v4, 0.0  ;;  %v623_v49 = vpack.c.bf16 %v587_v8, %v586_v13  ;;  %v590_v22 = vmax.f32 %v510_v11, 0.0 }
 0x10d   :  { %v610_v1 = vpack.c.bf16 %v561_v62, %v560_v61  ;;  %v582_v61 = vmax.f32 %v478_v50, 0.0  ;;  %v583_v62 = vmax.f32 %v481_v6, 0.0  ;;  %v517_v0 = vpop.f32.mrf.mxu1  ;;  %v591_v23 = vmax.f32 %v513_v58, 0.0 }
 0x10e   :  { %v518_v17 = vadd.f32 %v2379_v40, %v517_v0  ;;  %v526_v28 = vadd.f32 %v1940_v57, %v2379_v40 }
 0x10f   :  { %1978 = vmatprep.mubr.msk.bf16.mxu1 %vm667_vm1, %v610_v1  ;;  %v622_v1 = vpack.c.bf16 %v585_v59, %v584_v63  ;;  %v621_v5 = vpack.c.bf16 %v583_v62, %v582_v61  ;;  %v1941_v7 = vpop.f32.mrf.mxu1  ;;  %v625_v25 = vpack.c.bf16 %v591_v23, %v590_v22 }
 0x110   :  { %1979 = vmatmul.mubr.msk.bf16.gmra.mxu1 %vm667_vm1, %v611_v9  ;;  %v529_v29 = vadd.f32 %v1941_v7, %v2379_v40  ;;  %v594_v26 = vmax.f32 %v526_v28, 0.0 }
 0x111   :  { %1982 = vmatprep.mubr.msk.bf16.mxu1 %vm667_vm1, %v612_v2  ;;  %v502_v2 = vadd.f32 %v2379_v40, %v501_v60  ;;  %v520_v14 = vpop.f32.mrf.mxu1 }
 0x113   :  { %v588_v9 = vmax.f32 %v502_v2, 0.0 }
 0x115   :  { %v624_v15 = vpack.c.bf16 %v589_v10, %v588_v9 }
 0x118   :  { %1983 = vmatmul.mubr.msk.bf16.gmra.mxu1 %vm667_vm1, %v613_v19  ;;  %v592_v19 = vmax.f32 %v518_v17, 0.0 }
 0x119   :  { %1986 = vmatprep.mubr.msk.bf16.mxu1 %vm667_vm1, %v614_v18  ;;  %v521_v18 = vadd.f32 %v2379_v40, %v520_v14 }
 0x11b   :  { %v593_v20 = vmax.f32 %v521_v18, 0.0 }
 0x11d   :  { %v626_v24 = vpack.c.bf16 %v593_v20, %v592_v19 }
 0x120   :  { %1987 = vmatmul.mubr.msk.bf16.gmra.mxu1 %vm667_vm1, %v615_v31 }
 0x121   :  { %1990 = vmatprep.mubr.msk.bf16.mxu1 %vm667_vm1, %v616_v30  ;;  %v595_v30 = vmax.f32 %v529_v29, 0.0 }
 0x123   :  { %v627_v41 = vpack.c.bf16 %v595_v30, %v594_v26 }
 0x128   :  { %1991 = vmatmul.mubr.msk.bf16.gmra.mxu1 %vm667_vm1, %v617_v21 }
 0x129   :  { %1994 = vmatprep.mubr.msk.bf16.mxu1 %vm667_vm1, %v618_v42 }
 0x130   :  { %1995 = vmatmul.mubr.msk.bf16.gmra.mxu1 %vm667_vm1, %v619_v54 }
 0x131   :  { %1998 = vmatprep.mubr.msk.bf16.mxu1 %vm667_vm1, %v620_v36 }
 0x138   :  { %1999 = vmatmul.mubr.msk.bf16.gmra.mxu1 %vm667_vm1, %v621_v5 }
 0x139   :  { %2002 = vmatprep.mubr.msk.bf16.mxu1 %vm667_vm1, %v622_v1 }
 0x140   :  { %2003 = vmatmul.mubr.msk.bf16.gmra.mxu1 %vm667_vm1, %v623_v49 }
 0x141   :  { %2006 = vmatprep.mubr.msk.bf16.mxu1 %vm667_vm1, %v624_v15 }
 0x148   :  { %2007 = vmatmul.mubr.msk.bf16.gmra.mxu1 %vm667_vm1, %v625_v25 }
 0x149   :  { %2010 = vmatprep.mubr.msk.bf16.mxu1 %vm667_vm1, %v626_v24 }
 0x150   :  { %2011 = vmatmul.mubr.msk.bf16.gmra.mxu1 %vm667_vm1, %v627_v41 }
 0x198   :  { %v1952_v3 = vpop.f32.mrf.mxu1 }
 0x199   :  { %v807_v35 = vadd.f32 %v1952_v3, %v2546_v12 }
 0x19a   :  { %v798_v31 = vpop.f32.mrf.mxu1 }
 0x19b   :  { %v799_v34 = vadd.f32 %v2546_v12, %v798_v31  ;;  %v1055_v43 = vmax.f32 %v807_v35, 0.0 }
 0x19c   :  { %v1953_v33 = vpop.f32.mrf.mxu1 }
 0x19d   :  { %v810_v40 = vadd.f32 %v1953_v33, %v2546_v12  ;;  %v1053_v42 = vmax.f32 %v799_v34, 0.0 }
 0x19e   :  { %v801_v37 = vpop.f32.mrf.mxu1 }
 0x19f   :  { %v802_v38 = vadd.f32 %v2546_v12, %v801_v37  ;;  %v1056_v39 = vmax.f32 %v810_v40, 0.0 }
 0x1a0   :  { %v1956_v60 = vpop.f32.mrf.mxu1 }
 0x1a1   :  { %v1054_v16 = vmax.f32 %v802_v38, 0.0  ;;  %v1118_v44 = vpack.c.bf16 %v1056_v39, %v1055_v43  ;;  %v823_v51 = vadd.f32 %v1956_v60, %v2546_v12 }
 0x1a2   :  { %v814_v21 = vpop.f32.mrf.mxu1 }
 0x1a3   :  { %v1117_v32 = vpack.c.bf16 %v1054_v16, %v1053_v42  ;;  %v815_v46 = vadd.f32 %v2546_v12, %v814_v21  ;;  %v1059_v50 = vmax.f32 %v823_v51, 0.0 }
 0x1a4   :  { %v1957_v45 = vpop.f32.mrf.mxu1 }
 0x1a5   :  { %v826_v47 = vadd.f32 %v1957_v45, %v2546_v12  ;;  %2018 = vmatprep.mubr.msk.bf16.mxu0 %vm146_vm0, %v1117_v32  ;;  %v1057_v56 = vmax.f32 %v815_v46, 0.0 }
 0x1a6   :  { %v817_v52 = vpop.f32.mrf.mxu1  ;;  %2019 = vmatmul.mubr.msk.bf16.vlgmr.msra.gmra.mxu0 %vm146_vm0, %v1118_v44 }
 0x1a7   :  { %v818_v53 = vadd.f32 %v2546_v12, %v817_v52  ;;  %v1060_v36 = vmax.f32 %v826_v47, 0.0 }
 0x1a8   :  { %v1960_v55 = vpop.f32.mrf.mxu1 }
 0x1a9   :  { %v1058_v54 = vmax.f32 %v818_v53, 0.0  ;;  %v1120_v63 = vpack.c.bf16 %v1060_v36, %v1059_v50  ;;  %v839_v0 = vadd.f32 %v1960_v55, %v2546_v12 }
 0x1aa   :  { %v830_v6 = vpop.f32.mrf.mxu1 }
 0x1ab   :  { %v1119_v57 = vpack.c.bf16 %v1058_v54, %v1057_v56  ;;  %v831_v61 = vadd.f32 %v2546_v12, %v830_v6  ;;  %v1063_v7 = vmax.f32 %v839_v0, 0.0 }
 0x1ac   :  { %v1961_v59 = vpop.f32.mrf.mxu1 }
 0x1ad   :  { %v842_v62 = vadd.f32 %v1961_v59, %v2546_v12  ;;  %2022 = vmatprep.mubr.msk.bf16.mxu0 %vm146_vm0, %v1119_v57  ;;  %v1061_v27 = vmax.f32 %v831_v61, 0.0 }
 0x1ae   :  { %v833_v1 = vpop.f32.mrf.mxu1  ;;  %2023 = vmatmul.mubr.msk.bf16.gmra.mxu0 %vm146_vm0, %v1120_v63 }
 0x1af   :  { %v834_v2 = vadd.f32 %v2546_v12, %v833_v1  ;;  %v1064_v4 = vmax.f32 %v842_v62, 0.0 }
 0x1b0   :  { %v1964_v5 = vpop.f32.mrf.mxu1 }
 0x1b1   :  { %v1062_v48 = vmax.f32 %v834_v2, 0.0  ;;  %v1122_v13 = vpack.c.bf16 %v1064_v4, %v1063_v7  ;;  %v855_v17 = vadd.f32 %v1964_v5, %v2546_v12 }
 0x1b2   :  { %v846_v9 = vpop.f32.mrf.mxu1 }
 0x1b3   :  { %v1121_v10 = vpack.c.bf16 %v1062_v48, %v1061_v27  ;;  %v847_v14 = vadd.f32 %v2546_v12, %v846_v9  ;;  %v1067_v22 = vmax.f32 %v855_v17, 0.0 }
 0x1b4   :  { %v1965_v8 = vpop.f32.mrf.mxu1 }
 0x1b5   :  { %v858_v15 = vadd.f32 %v1965_v8, %v2546_v12  ;;  %2026 = vmatprep.mubr.msk.bf16.mxu0 %vm146_vm0, %v1121_v10  ;;  %v1065_v19 = vmax.f32 %v847_v14, 0.0 }
 0x1b6   :  { %v849_v18 = vpop.f32.mrf.mxu1  ;;  %2027 = vmatmul.mubr.msk.bf16.gmra.mxu0 %vm146_vm0, %v1122_v13 }
 0x1b7   :  { %v850_v49 = vadd.f32 %v2546_v12, %v849_v18  ;;  %v1068_v11 = vmax.f32 %v858_v15, 0.0 }
 0x1b8   :  { %v1968_v58 = vpop.f32.mrf.mxu1 }
 0x1b9   :  { %v1066_v20 = vmax.f32 %v850_v49, 0.0  ;;  %v1124_v25 = vpack.c.bf16 %v1068_v11, %v1067_v22  ;;  %v871_v30 = vadd.f32 %v1968_v58, %v2546_v12 }
 0x1ba   :  { %v862_v23 = vpop.f32.mrf.mxu1 }
 0x1bb   :  { %v1123_v24 = vpack.c.bf16 %v1066_v20, %v1065_v19  ;;  %v863_v29 = vadd.f32 %v2546_v12, %v862_v23  ;;  %v1071_v35 = vmax.f32 %v871_v30, 0.0 }
 0x1bc   :  { %v1969_v28 = vpop.f32.mrf.mxu1 }
 0x1bd   :  { %v874_v26 = vadd.f32 %v1969_v28, %v2546_v12  ;;  %2030 = vmatprep.mubr.msk.bf16.mxu0 %vm146_vm0, %v1123_v24  ;;  %v1069_v34 = vmax.f32 %v863_v29, 0.0 }
 0x1be   :  { %v865_v41 = vpop.f32.mrf.mxu1  ;;  %2031 = vmatmul.mubr.msk.bf16.gmra.mxu0 %vm146_vm0, %v1124_v25 }
 0x1bf   :  { %v866_v3 = vadd.f32 %v2546_v12, %v865_v41  ;;  %v1072_v31 = vmax.f32 %v874_v26, 0.0 }
 0x1c0   :  { %v1972_v33 = vpop.f32.mrf.mxu1 }
 0x1c1   :  { %v1070_v40 = vmax.f32 %v866_v3, 0.0  ;;  %v1126_v39 = vpack.c.bf16 %v1072_v31, %v1071_v35  ;;  %v887_v43 = vadd.f32 %v1972_v33, %v2546_v12 }
 0x1c2   :  { %v878_v37 = vpop.f32.mrf.mxu1 }
 0x1c3   :  { %v1125_v38 = vpack.c.bf16 %v1070_v40, %v1069_v34  ;;  %v879_v42 = vadd.f32 %v2546_v12, %v878_v37  ;;  %v1075_v51 = vmax.f32 %v887_v43, 0.0 }
 0x1c4   :  { %v1973_v60 = vpop.f32.mrf.mxu1 }
 0x1c5   :  { %v890_v16 = vadd.f32 %v1973_v60, %v2546_v12  ;;  %2034 = vmatprep.mubr.msk.bf16.mxu0 %vm146_vm0, %v1125_v38  ;;  %v1073_v46 = vmax.f32 %v879_v42, 0.0 }
 0x1c6   :  { %v881_v21 = vpop.f32.mrf.mxu1  ;;  %2035 = vmatmul.mubr.msk.bf16.gmra.mxu0 %vm146_vm0, %v1126_v39 }
 0x1c7   :  { %v882_v32 = vadd.f32 %v2546_v12, %v881_v21  ;;  %v1076_v44 = vmax.f32 %v890_v16, 0.0 }
 0x1c8   :  { %v1976_v45 = vpop.f32.mrf.mxu1 }
 0x1c9   :  { %v1074_v47 = vmax.f32 %v882_v32, 0.0  ;;  %v1128_v36 = vpack.c.bf16 %v1076_v44, %v1075_v51  ;;  %v903_v50 = vadd.f32 %v1976_v45, %v2546_v12 }
 0x1ca   :  { %v894_v52 = vpop.f32.mrf.mxu1 }
 0x1cb   :  { %v1127_v53 = vpack.c.bf16 %v1074_v47, %v1073_v46  ;;  %v895_v56 = vadd.f32 %v2546_v12, %v894_v52  ;;  %v1079_v0 = vmax.f32 %v903_v50, 0.0 }
 0x1cc   :  { %v1977_v55 = vpop.f32.mrf.mxu1 }
 0x1cd   :  { %v906_v54 = vadd.f32 %v1977_v55, %v2546_v12  ;;  %2038 = vmatprep.mubr.msk.bf16.mxu0 %vm146_vm0, %v1127_v53  ;;  %v1077_v61 = vmax.f32 %v895_v56, 0.0 }
 0x1ce   :  { %v897_v6 = vpop.f32.mrf.mxu1  ;;  %2039 = vmatmul.mubr.msk.bf16.gmra.mxu0 %vm146_vm0, %v1128_v36 }
 0x1cf   :  { %v898_v57 = vadd.f32 %v2546_v12, %v897_v6  ;;  %v1080_v63 = vmax.f32 %v906_v54, 0.0 }
 0x1d0   :  { %v1980_v59 = vpop.f32.mrf.mxu1 }
 0x1d1   :  { %v1078_v62 = vmax.f32 %v898_v57, 0.0  ;;  %v1130_v4 = vpack.c.bf16 %v1080_v63, %v1079_v0  ;;  %v919_v7 = vadd.f32 %v1980_v59, %v2546_v12 }
 0x1d2   :  { %v910_v1 = vpop.f32.mrf.mxu1 }
 0x1d3   :  { %v1129_v2 = vpack.c.bf16 %v1078_v62, %v1077_v61  ;;  %v911_v27 = vadd.f32 %v2546_v12, %v910_v1  ;;  %v1083_v17 = vmax.f32 %v919_v7, 0.0 }
 0x1d4   :  { %v1981_v5 = vpop.f32.mrf.mxu1 }
 0x1d5   :  { %v922_v48 = vadd.f32 %v1981_v5, %v2546_v12  ;;  %2042 = vmatprep.mubr.msk.bf16.mxu0 %vm146_vm0, %v1129_v2  ;;  %v1081_v14 = vmax.f32 %v911_v27, 0.0 }
 0x1d6   :  { %v913_v9 = vpop.f32.mrf.mxu1  ;;  %2043 = vmatmul.mubr.msk.bf16.gmra.mxu0 %vm146_vm0, %v1130_v4 }
 0x1d7   :  { %v914_v10 = vadd.f32 %v2546_v12, %v913_v9  ;;  %v1084_v13 = vmax.f32 %v922_v48, 0.0 }
 0x1d8   :  { %v1984_v8 = vpop.f32.mrf.mxu1 }
 0x1d9   :  { %v1082_v15 = vmax.f32 %v914_v10, 0.0  ;;  %v1132_v11 = vpack.c.bf16 %v1084_v13, %v1083_v17  ;;  %v935_v22 = vadd.f32 %v1984_v8, %v2546_v12 }
 0x1da   :  { %v926_v18 = vpop.f32.mrf.mxu1 }
 0x1db   :  { %v1131_v49 = vpack.c.bf16 %v1082_v15, %v1081_v14  ;;  %v927_v19 = vadd.f32 %v2546_v12, %v926_v18  ;;  %v1087_v30 = vmax.f32 %v935_v22, 0.0 }
 0x1dc   :  { %v1985_v58 = vpop.f32.mrf.mxu1 }
 0x1dd   :  { %v938_v20 = vadd.f32 %v1985_v58, %v2546_v12  ;;  %2046 = vmatprep.mubr.msk.bf16.mxu0 %vm146_vm0, %v1131_v49  ;;  %v1085_v29 = vmax.f32 %v927_v19, 0.0 }
 0x1de   :  { %v929_v23 = vpop.f32.mrf.mxu1  ;;  %2047 = vmatmul.mubr.msk.bf16.gmra.mxu0 %vm146_vm0, %v1132_v11 }
 0x1df   :  { %v930_v24 = vadd.f32 %v2546_v12, %v929_v23  ;;  %v1088_v25 = vmax.f32 %v938_v20, 0.0 }
 0x1e0   :  { %v1988_v28 = vpop.f32.mrf.mxu1 }
 0x1e1   :  { %v1086_v26 = vmax.f32 %v930_v24, 0.0  ;;  %v1134_v31 = vpack.c.bf16 %v1088_v25, %v1087_v30  ;;  %v951_v35 = vadd.f32 %v1988_v28, %v2546_v12 }
 0x1e2   :  { %v942_v41 = vpop.f32.mrf.mxu1 }
 0x1e3   :  { %v1133_v3 = vpack.c.bf16 %v1086_v26, %v1085_v29  ;;  %v943_v34 = vadd.f32 %v2546_v12, %v942_v41  ;;  %v1091_v43 = vmax.f32 %v951_v35, 0.0 }
 0x1e4   :  { %v1989_v33 = vpop.f32.mrf.mxu1 }
 0x1e5   :  { %v954_v40 = vadd.f32 %v1989_v33, %v2546_v12  ;;  %2050 = vmatprep.mubr.msk.bf16.mxu0 %vm146_vm0, %v1133_v3  ;;  %v1089_v42 = vmax.f32 %v943_v34, 0.0 }
 0x1e6   :  { %v945_v37 = vpop.f32.mrf.mxu1  ;;  %2051 = vmatmul.mubr.msk.bf16.gmra.mxu0 %vm146_vm0, %v1134_v31 }
 0x1e7   :  { %v946_v38 = vadd.f32 %v2546_v12, %v945_v37  ;;  %v1092_v39 = vmax.f32 %v954_v40, 0.0 }
 0x1e8   :  { %v1992_v60 = vpop.f32.mrf.mxu1 }
 0x1e9   :  { %v1090_v16 = vmax.f32 %v946_v38, 0.0  ;;  %v1136_v44 = vpack.c.bf16 %v1092_v39, %v1091_v43  ;;  %v967_v51 = vadd.f32 %v1992_v60, %v2546_v12 }
 0x1ea   :  { %v958_v21 = vpop.f32.mrf.mxu1 }
 0x1eb   :  { %v1135_v32 = vpack.c.bf16 %v1090_v16, %v1089_v42  ;;  %v959_v46 = vadd.f32 %v2546_v12, %v958_v21  ;;  %v1095_v50 = vmax.f32 %v967_v51, 0.0 }
 0x1ec   :  { %v1993_v45 = vpop.f32.mrf.mxu1 }
 0x1ed   :  { %v970_v47 = vadd.f32 %v1993_v45, %v2546_v12  ;;  %2054 = vmatprep.mubr.msk.bf16.mxu0 %vm146_vm0, %v1135_v32  ;;  %v1093_v56 = vmax.f32 %v959_v46, 0.0 }
 0x1ee   :  { %v961_v52 = vpop.f32.mrf.mxu1  ;;  %2055 = vmatmul.mubr.msk.bf16.gmra.mxu0 %vm146_vm0, %v1136_v44 }
 0x1ef   :  { %v962_v53 = vadd.f32 %v2546_v12, %v961_v52  ;;  %v1096_v36 = vmax.f32 %v970_v47, 0.0 }
 0x1f0   :  { %v1996_v55 = vpop.f32.mrf.mxu1 }
 0x1f1   :  { %v1094_v54 = vmax.f32 %v962_v53, 0.0  ;;  %v1138_v63 = vpack.c.bf16 %v1096_v36, %v1095_v50  ;;  %v983_v0 = vadd.f32 %v1996_v55, %v2546_v12 }
 0x1f2   :  { %v974_v6 = vpop.f32.mrf.mxu1 }
 0x1f3   :  { %v1137_v57 = vpack.c.bf16 %v1094_v54, %v1093_v56  ;;  %v975_v61 = vadd.f32 %v2546_v12, %v974_v6  ;;  %v1099_v7 = vmax.f32 %v983_v0, 0.0 }
 0x1f4   :  { %v1997_v59 = vpop.f32.mrf.mxu1 }
 0x1f5   :  { %v986_v62 = vadd.f32 %v1997_v59, %v2546_v12  ;;  %2058 = vmatprep.mubr.msk.bf16.mxu0 %vm146_vm0, %v1137_v57  ;;  %v1097_v27 = vmax.f32 %v975_v61, 0.0 }
 0x1f6   :  { %v977_v1 = vpop.f32.mrf.mxu1  ;;  %2059 = vmatmul.mubr.msk.bf16.gmra.mxu0 %vm146_vm0, %v1138_v63 }
 0x1f7   :  { %v978_v2 = vadd.f32 %v2546_v12, %v977_v1  ;;  %v1100_v4 = vmax.f32 %v986_v62, 0.0 }
 0x1f8   :  { %v2000_v5 = vpop.f32.mrf.mxu1 }
 0x1f9   :  { %v1098_v48 = vmax.f32 %v978_v2, 0.0  ;;  %v1140_v13 = vpack.c.bf16 %v1100_v4, %v1099_v7  ;;  %v999_v17 = vadd.f32 %v2000_v5, %v2546_v12  ;;  %v1735_v2 = vld [vmem:[%s2656_s6] ss:$0 sm:$0xff] }
 0x1fa   :  { %v990_v9 = vpop.f32.mrf.mxu1 }
 0x1fb   :  { %v1139_v10 = vpack.c.bf16 %v1098_v48, %v1097_v27  ;;  %v991_v14 = vadd.f32 %v2546_v12, %v990_v9  ;;  %v1103_v22 = vmax.f32 %v999_v17, 0.0 }
 0x1fc   :  { %v2001_v8 = vpop.f32.mrf.mxu1 }
 0x1fd   :  { %v1002_v15 = vadd.f32 %v2001_v8, %v2546_v12  ;;  %2062 = vmatprep.mubr.msk.bf16.mxu0 %vm146_vm0, %v1139_v10  ;;  %v1101_v19 = vmax.f32 %v991_v14, 0.0 }
 0x1fe   :  { %v993_v18 = vpop.f32.mrf.mxu1  ;;  %2063 = vmatmul.mubr.msk.bf16.gmra.mxu0 %vm146_vm0, %v1140_v13 }
 0x1ff   :  { %v994_v49 = vadd.f32 %v2546_v12, %v993_v18  ;;  %v1104_v11 = vmax.f32 %v1002_v15, 0.0 }
 0x200   :  { %v2004_v58 = vpop.f32.mrf.mxu1 }
 0x201   :  { %v1102_v20 = vmax.f32 %v994_v49, 0.0  ;;  %v1142_v25 = vpack.c.bf16 %v1104_v11, %v1103_v22  ;;  %v1015_v30 = vadd.f32 %v2004_v58, %v2546_v12 }
 0x202   :  { %v1006_v23 = vpop.f32.mrf.mxu1 }
 0x203   :  { %v1141_v24 = vpack.c.bf16 %v1102_v20, %v1101_v19  ;;  %v1007_v29 = vadd.f32 %v2546_v12, %v1006_v23  ;;  %v1107_v35 = vmax.f32 %v1015_v30, 0.0 }
 0x204   :  { %v2005_v28 = vpop.f32.mrf.mxu1 }
 0x205   :  { %v1018_v26 = vadd.f32 %v2005_v28, %v2546_v12  ;;  %2066 = vmatprep.mubr.msk.bf16.mxu0 %vm146_vm0, %v1141_v24  ;;  %v1105_v34 = vmax.f32 %v1007_v29, 0.0 }
 0x206   :  { %v1009_v41 = vpop.f32.mrf.mxu1  ;;  %2067 = vmatmul.mubr.msk.bf16.gmra.mxu0 %vm146_vm0, %v1142_v25 }
 0x207   :  { %v1010_v3 = vadd.f32 %v2546_v12, %v1009_v41  ;;  %v1108_v31 = vmax.f32 %v1018_v26, 0.0 }
 0x208   :  { %v2008_v33 = vpop.f32.mrf.mxu1 }
 0x209   :  { %v1106_v40 = vmax.f32 %v1010_v3, 0.0  ;;  %v1144_v39 = vpack.c.bf16 %v1108_v31, %v1107_v35  ;;  %v1031_v43 = vadd.f32 %v2008_v33, %v2546_v12 }
 0x20a   :  { %v1022_v37 = vpop.f32.mrf.mxu1 }
 0x20b   :  { %v1143_v38 = vpack.c.bf16 %v1106_v40, %v1105_v34  ;;  %v1023_v42 = vadd.f32 %v2546_v12, %v1022_v37  ;;  %v1111_v51 = vmax.f32 %v1031_v43, 0.0 }
 0x20c   :  { %v2009_v60 = vpop.f32.mrf.mxu1 }
 0x20d   :  { %v1034_v16 = vadd.f32 %v2009_v60, %v2546_v12  ;;  %2070 = vmatprep.mubr.msk.bf16.mxu0 %vm146_vm0, %v1143_v38  ;;  %v1109_v46 = vmax.f32 %v1023_v42, 0.0 }
 0x20e   :  { %v1025_v21 = vpop.f32.mrf.mxu1  ;;  %2071 = vmatmul.mubr.msk.bf16.gmra.mxu0 %vm146_vm0, %v1144_v39 }
 0x20f   :  { %v1026_v32 = vadd.f32 %v2546_v12, %v1025_v21  ;;  %v1112_v44 = vmax.f32 %v1034_v16, 0.0 }
 0x210   :  { %v2012_v45 = vpop.f32.mrf.mxu1 }
 0x211   :  { %v1110_v47 = vmax.f32 %v1026_v32, 0.0  ;;  %v1146_v36 = vpack.c.bf16 %v1112_v44, %v1111_v51  ;;  %v1047_v50 = vadd.f32 %v2012_v45, %v2546_v12 }
 0x212   :  { %v1038_v52 = vpop.f32.mrf.mxu1 }
 0x213   :  { %v1145_v53 = vpack.c.bf16 %v1110_v47, %v1109_v46  ;;  %v1039_v56 = vadd.f32 %v2546_v12, %v1038_v52  ;;  %v1115_v62 = vmax.f32 %v1047_v50, 0.0 }
 0x214   :  { %v2013_v55 = vpop.f32.mrf.mxu1 }
 0x215   :  { %v1050_v54 = vadd.f32 %v2013_v55, %v2546_v12  ;;  %2074 = vmatprep.mubr.msk.bf16.mxu0 %vm146_vm0, %v1145_v53  ;;  %v1113_v59 = vmax.f32 %v1039_v56, 0.0 }
 0x216   :  { %v1041_v6 = vpop.f32.mrf.mxu1  ;;  %2075 = vmatmul.mubr.msk.bf16.gmra.mxu0 %vm146_vm0, %v1146_v36 }
 0x217   :  { %v1042_v57 = vadd.f32 %v2546_v12, %v1041_v6  ;;  %v1116_v63 = vmax.f32 %v1050_v54, 0.0 }
 0x219   :  { %v1114_v61 = vmax.f32 %v1042_v57, 0.0  ;;  %v1148_v1 = vpack.c.bf16 %v1116_v63, %v1115_v62 }
 0x21b   :  { %v1147_v0 = vpack.c.bf16 %v1114_v61, %v1113_v59 }
 0x21d   :  { %2078 = vmatprep.mubr.msk.bf16.mxu0 %vm146_vm0, %v1147_v0 }
 0x21e   :  { %2079 = vmatmul.mubr.msk.bf16.gmra.mxu0 %vm146_vm0, %v1148_v1 }
 0x266   :  { %v2020_v4 = vpop.f32.mrf.mxu0 }
 0x268   :  { %v1302_v5 = vpop.f32.mrf.mxu0 }
 0x269   :  { %v1303_v27 = vadd.f32 %v1735_v2, %v1302_v5 }
 0x26a   :  { %v2021_v48 = vpop.f32.mrf.mxu0 }
 0x26b   :  { %1558 = vst.msk [vmem:[#allocation2] sm:$0xff] %vm1557_vm2, %v1303_v27 }
 0x26c   :  { %v1305_v12 = vpop.f32.mrf.mxu0 }
 0x26e   :  { %v2024_v7 = vpop.f32.mrf.mxu0 }
 0x270   :  { %v1318_v9 = vpop.f32.mrf.mxu0 }
 0x272   :  { %v1652_v10 = vld [vmem:[#allocation2] sm:$0xff]  ;;  %v2025_v13 = vpop.f32.mrf.mxu0 }
 0x273   :  { %1653 = vst [vmem:[%s2657_s7] sm:$0xff] %v1652_v10 }
 0x274   :  { %v1321_v8 = vpop.f32.mrf.mxu0 }
 0x276   :  { %v2028_v14 = vpop.f32.mrf.mxu0 }
 0x278   :  { %v1334_v15 = vpop.f32.mrf.mxu0 }
 0x27a   :  { %v2029_v17 = vpop.f32.mrf.mxu0 }
 0x27c   :  { %v1337_v18 = vpop.f32.mrf.mxu0 }
 0x27e   :  { %v2032_v49 = vpop.f32.mrf.mxu0 }
 0x280   :  { %v1350_v11 = vpop.f32.mrf.mxu0 }
 0x282   :  { %v2033_v58 = vpop.f32.mrf.mxu0 }
 0x284   :  { %v1353_v19 = vpop.f32.mrf.mxu0 }
 0x286   :  { %v2036_v20 = vpop.f32.mrf.mxu0 }
 0x288   :  { %v1366_v22 = vpop.f32.mrf.mxu0 }
 0x28a   :  { %v2037_v23 = vpop.f32.mrf.mxu0 }
 0x28c   :  { %v1369_v24 = vpop.f32.mrf.mxu0 }
 0x28e   :  { %v2040_v25 = vpop.f32.mrf.mxu0 }
 0x290   :  { %v1382_v28 = vpop.f32.mrf.mxu0 }
 0x292   :  { %v2041_v29 = vpop.f32.mrf.mxu0 }
 0x294   :  { %v1385_v26 = vpop.f32.mrf.mxu0 }
 0x296   :  { %v2044_v30 = vpop.f32.mrf.mxu0 }
 0x298   :  { %v1398_v41 = vpop.f32.mrf.mxu0 }
 0x29a   :  { %v2045_v3 = vpop.f32.mrf.mxu0 }
 0x29c   :  { %v1401_v31 = vpop.f32.mrf.mxu0 }
 0x29e   :  { %v2048_v33 = vpop.f32.mrf.mxu0 }
 0x2a0   :  { %v1414_v34 = vpop.f32.mrf.mxu0 }
 0x2a2   :  { %v2049_v40 = vpop.f32.mrf.mxu0 }
 0x2a4   :  { %v1417_v35 = vpop.f32.mrf.mxu0 }
 0x2a6   :  { %v2052_v37 = vpop.f32.mrf.mxu0 }
 0x2a8   :  { %v1430_v38 = vpop.f32.mrf.mxu0 }
 0x2aa   :  { %v2053_v39 = vpop.f32.mrf.mxu0 }
 0x2ac   :  { %v1433_v60 = vpop.f32.mrf.mxu0 }
 0x2ae   :  { %v2056_v42 = vpop.f32.mrf.mxu0 }
 0x2b0   :  { %v1446_v16 = vpop.f32.mrf.mxu0 }
 0x2b2   :  { %v2057_v43 = vpop.f32.mrf.mxu0 }
 0x2b4   :  { %v1449_v21 = vpop.f32.mrf.mxu0 }
 0x2b6   :  { %v2060_v32 = vpop.f32.mrf.mxu0 }
 0x2b8   :  { %v1462_v44 = vpop.f32.mrf.mxu0 }
 0x2ba   :  { %v2061_v45 = vpop.f32.mrf.mxu0 }
 0x2bc   :  { %v1465_v46 = vpop.f32.mrf.mxu0 }
 0x2be   :  { %v2064_v47 = vpop.f32.mrf.mxu0 }
 0x2c0   :  { %v1478_v51 = vpop.f32.mrf.mxu0 }
 0x2c2   :  { %v2065_v52 = vpop.f32.mrf.mxu0 }
 0x2c4   :  { %v1481_v53 = vpop.f32.mrf.mxu0 }
 0x2c6   :  { %v2068_v36 = vpop.f32.mrf.mxu0 }
 0x2c8   :  { %v1494_v55 = vpop.f32.mrf.mxu0 }
 0x2ca   :  { %v2069_v56 = vpop.f32.mrf.mxu0 }
 0x2cc   :  { %v1497_v54 = vpop.f32.mrf.mxu0 }
 0x2ce   :  { %v2072_v50 = vpop.f32.mrf.mxu0 }
 0x2d0   :  { %v1510_v6 = vpop.f32.mrf.mxu0 }
 0x2d2   :  { %v2073_v57 = vpop.f32.mrf.mxu0 }
 0x2d4   :  { %v1513_v63 = vpop.f32.mrf.mxu0 }
 0x2d6   :  { %v2076_v59 = vpop.f32.mrf.mxu0 }
 0x2d8   :  { %v1526_v61 = vpop.f32.mrf.mxu0 }
 0x2da   :  { %v2077_v62 = vpop.f32.mrf.mxu0 }
 0x2dc   :  { %v1529_v0 = vpop.f32.mrf.mxu0 }
 0x2de   :  { %v2080_v1 = vpop.f32.mrf.mxu0 }
 0x2e0   :  { %v1542_v2 = vpop.f32.mrf.mxu0 }
 0x2e2   :  { %v2081_v4 = vpop.f32.mrf.mxu0 }
 0x2e4   :  { %v1545_v5 = vpop.f32.mrf.mxu0 }

</bundles_post_ra>
